<compile_context>
chip_gen: v6e
topology: v6e:2x2x1
jax: 0.10.0
libtpu: 0.0.40
codegen_flags: <defaults>
</compile_context>

<pallas_src>
import math

import jax
import jax.numpy as jnp
from jax.experimental import pallas as pl
from jax.experimental.pallas import tpu as pltpu


# ---------------------------------------------------------------------------
# Pallas kernel: lane-dense broadcasted elementwise add
# ---------------------------------------------------------------------------
def _tape_add_kernel(x_ref, pe_ref, o_ref):
    # x_ref / o_ref: (tb, tc) tiles of the flattened [B, L*D] view.
    # pe_ref:        (1, tc) tile of the flattened [1, L*D] PE table
    #                -> sublane broadcast on the VPU, no explicit reshape needed.
    o_ref[...] = x_ref[...] + pe_ref[...]


# ---------------------------------------------------------------------------
# Tile-size selection (trace-time Python, static shapes)
# ---------------------------------------------------------------------------
def _round_up(x, m):
    return ((x + m - 1) // m) * m


def _pick_tiles(B, N, itemsize, max_tile_bytes):
    """Return (tb, tc, B_pad, N_pad): tile sizes and padded array dims.

    Guarantees tiles satisfy the (pack, 128) layout rule (or equal the full
    padded dims), stay within max_tile_bytes, and that the grid has >= 2 steps
    whenever the problem is splittable (v7x megacore).
    """
    pack = max(8, 32 // itemsize)                   # sublanes/vreg for dtype
    max_tile_bytes = min(max_tile_bytes, 8 << 20)   # v7x 64 MiB VMEM safety cap
    max_tile_elems = max(max_tile_bytes // itemsize, 128 * pack)

    # Columns first (lane-dense): leave room for at least min(B, pack) rows.
    col_budget = max(128, max_tile_elems // max(1, min(B, pack)))
    if N <= col_budget:
        tc, N_pad = N, N                            # full-width block, no padding
    else:
        tc = max(128, (col_budget // 128) * 128)
        N_pad = _round_up(N, tc)

    # Rows with the remaining budget.
    row_budget = max(1, max_tile_elems // tc)
    if B <= row_budget:
        tb, B_pad = B, B                            # whole batch in one row tile
    else:
        tb = max(pack, (row_budget // pack) * pack)
        B_pad = _round_up(B, tb)

    # v7x megacore: ensure >= 2 grid steps along a "parallel" axis when possible.
    if (N_pad // tc) * (B_pad // tb) == 1:
        if N >= 256:
            tc_split = _round_up(pl.cdiv(N, 2), 128)
            if tc_split < N:
                tc = tc_split
                N_pad = _round_up(N, tc)
        if (N_pad // tc) * (B_pad // tb) == 1 and B >= 2 * pack:
            tb = _round_up(pl.cdiv(B, 2), pack)
            B_pad = _round_up(B, tb)

    return tb, tc, B_pad, N_pad


# ---------------------------------------------------------------------------
# Forward wrapper
# ---------------------------------------------------------------------------
def tape_forward(x, pe, *, max_tile_bytes=4 << 20, xla_bypass_bytes=256 << 10):
    """x: [B, L, D], pe: [L, D] -> [B, L, D]  (eval-mode dropout == identity)."""
    B, L, D = x.shape
    assert pe.shape == (L, D)
    N = L * D
    itemsize = jnp.dtype(x.dtype).itemsize

    # Small-problem bypass: pallas_call dispatch + one grid step costs microseconds,
    # which dwarfs a few-KiB add; plain XLA is strictly faster there.
    if 2 * B * N * itemsize <= xla_bypass_bytes:
        return x + pe[None, :, :].astype(x.dtype)

    # Lane-dense flattened views (wrapper-side reshape only).
    x2 = x.reshape(B, N)
    pe2 = pe.reshape(1, N).astype(x.dtype)

    tb, tc, B_pad, N_pad = _pick_tiles(B, N, itemsize, max_tile_bytes)
    if B_pad != B or N_pad != N:
        x2 = jnp.pad(x2, ((0, B_pad - B), (0, N_pad - N)))
    if N_pad != N:
        pe2 = jnp.pad(pe2, ((0, 0), (0, N_pad - N)))

    nc, nb = N_pad // tc, B_pad // tb

    # Explicit VMEM budget from the tiles actually chosen:
    # double-buffered x + out tiles, double-buffered pe tile, plus headroom.
    vmem_bytes = int((4 * tb * tc + 2 * tc) * itemsize + (4 << 20))
    vmem_bytes = max(vmem_bytes, 16 << 20)

    out2 = pl.pallas_call(
        _tape_add_kernel,
        out_shape=jax.ShapeDtypeStruct((B_pad, N_pad), x.dtype),
        # Columns outer, batch inner: the pe block index is constant across the
        # inner loop, so Pallas does not re-DMA the table every step.
        grid=(nc, nb),
        in_specs=[
            pl.BlockSpec((tb, tc), lambda j, i: (i, j)),   # x tile
            pl.BlockSpec((1, tc), lambda j, i: (0, j)),    # pe tile (held per column)
        ],
        out_specs=pl.BlockSpec((tb, tc), lambda j, i: (i, j)),
        compiler_params=pltpu.CompilerParams(
            dimension_semantics=("parallel", "parallel"),
            vmem_limit_bytes=vmem_bytes,
        ),
    )(x2, pe2)

    if B_pad != B or N_pad != N:
        out2 = out2[:B, :N]
    return out2.reshape(B, L, D)


# ---------------------------------------------------------------------------
# Parameter (buffer) construction — deterministic, mirrors tAPE.__init__
# ---------------------------------------------------------------------------
def make_tape_pe(d_model, max_len=32, scale_factor=1.0, dtype=jnp.float32):
    position = jnp.arange(0, max_len, dtype=jnp.float32)[:, None]            # [L, 1]
    div_term = jnp.exp(
        jnp.arange(0, d_model, 2, dtype=jnp.float32)
        * (-math.log(10000.0) / d_model)
    )                                                                         # [ceil(D/2)]
    angles = position * div_term[None, :] * (d_model / max_len)               # [L, ceil(D/2)]
    pe = jnp.zeros((max_len, d_model), dtype=jnp.float32)
    pe = pe.at[:, 0::2].set(jnp.sin(angles))
    # Slice cos part so odd d_model does not shape-mismatch (latent bug in original).
    pe = pe.at[:, 1::2].set(jnp.cos(angles)[:, : d_model // 2])
    return (scale_factor * pe).astype(dtype)                                  # [L, D]


def tape_reference(x, pe):
    # Pure-JAX reference (eval-mode dropout == identity).
    return x + pe[None, :, :]


if __name__ == "__main__":
    # Small shapes consistent with the module: d_model=32, max_len=32, batch=4.
    B, L, D = 4, 32, 32

    key = jax.random.PRNGKey(0)
    x = jax.random.normal(key, (B, L, D), dtype=jnp.float32)
    pe = make_tape_pe(d_model=D, max_len=L, scale_factor=1.0)

    # Disable the XLA bypass so the Pallas kernel itself is exercised.
    y = tape_forward(x, pe, xla_bypass_bytes=0)
    y = jax.block_until_ready(y)

    y_ref = tape_reference(x, pe)
    assert y.shape == (B, L, D)
    assert jnp.allclose(y, y_ref, atol=1e-6, rtol=1e-6), "mismatch vs reference"

    print("KERNEL_OK")
</pallas_src>

<mosaic_0001>
module attributes {stable_mosaic.version = 11 : i64} {
  func.func @_tape_add_kernel(%arg0: i32, %arg1: i32, %arg2: memref<4x512xf32, #tpu.memory_space<vmem>>, %arg3: memref<1x512xf32, #tpu.memory_space<vmem>>, %arg4: memref<4x512xf32, #tpu.memory_space<vmem>>) attributes {dimension_semantics = [#tpu.dimension_semantics<parallel>, #tpu.dimension_semantics<parallel>], iteration_bounds = array<i64: 2, 1>, scalar_prefetch = 0 : i64, scratch_operands = 0 : i64, tpu.core_type = #tpu.core_type<tc>, window_params = [{transform_indices = @transform_0, window_bounds = array<i64: 4, 512>}, {transform_indices = @transform_1, window_bounds = array<i64: 1, 512>}, {transform_indices = @transform_2, window_bounds = array<i64: 4, 512>}]} {
    %c0 = arith.constant 0 : index
    %c0_0 = arith.constant 0 : index
    %0 = vector.load %arg2[%c0, %c0_0] : memref<4x512xf32, #tpu.memory_space<vmem>>, vector<4x512xf32>
    %c0_1 = arith.constant 0 : index
    %c0_2 = arith.constant 0 : index
    %1 = vector.load %arg3[%c0_1, %c0_2] : memref<1x512xf32, #tpu.memory_space<vmem>>, vector<1x512xf32>
    %2 = vector.broadcast %1 : vector<1x512xf32> to vector<4x512xf32>
    %3 = arith.addf %0, %2 : vector<4x512xf32>
    %c0_3 = arith.constant 0 : index
    %c0_4 = arith.constant 0 : index
    %4 = vector.load %arg4[%c0_3, %c0_4] : memref<4x512xf32, #tpu.memory_space<vmem>>, vector<4x512xf32>
    tpu.vector_store %arg4[%c0_3, %c0_4], %3 {strides = array<i32>} : memref<4x512xf32, #tpu.memory_space<vmem>>, vector<4x512xf32>,
    return
  }
  func.func @transform_0(%arg0: i32, %arg1: i32) -> (i32, i32) {
    %c0_i32 = arith.constant 0 : i32
    return %arg1, %arg0 : i32, i32
  }
  func.func @transform_1(%arg0: i32, %arg1: i32) -> (i32, i32) {
    %c0_i32 = arith.constant 0 : i32
    %c0_i32_0 = arith.constant 0 : i32
    return %c0_i32, %arg0 : i32, i32
  }
  func.func @transform_2(%arg0: i32, %arg1: i32) -> (i32, i32) {
    %c0_i32 = arith.constant 0 : i32
    return %arg1, %arg0 : i32, i32
  }
}

</mosaic_0001>

<bundles_post_ra>
// kernel: tpu_custom_call.1
= control target key start
LH: loop header
LB: loop body
LE: loop exit
PB: predicated region body
PF: predicated region fallthrough
CT: control target
= control target key end

     0   :  { %7 = vsyncpa [#allocation3], 0  ;;  %s790_s0 = inlined_call_operand.hbm [shape: f32[4,1024], index: 0, kind: input, shape index: {}]   ;;  %s791_s1 = inlined_call_operand.hbm [shape: f32[1,1024], index: 1, kind: input, shape index: {}]   ;;  %s792_s2 = inlined_call_operand.hbm [shape: f32[4,1024], index: 2, kind: output, shape index: {}]  }
   0x1   :  { %9 = vsyncpa [#allocation3 + $0x1], 0 }
   0x2   :  { %10 = vsyncpa [#allocation6], 0 }
   0x3   :  { %12 = vsyncpa [#allocation6 + $0x1], 0 }
   0x4   :  { %13 = vsyncpa [#allocation4], 0 }
   0x5   :  { %15 = vsyncpa [#allocation4 + $0x1], 0  ;;  %s620_s9 = smov 0   ;;  %s622_s10 = smov 0  }
   0x6   :  { %s624_s11 = smov 0   ;;  %s626_s12 = smov 0  }
   0x7   :  { %s628_s13 = smov 0   ;;  %s630_s14 = smov 0  }
   0x8 LB: > { %s371_s15 = sadd.s32 4294967295, %s600_s14   ;;  %s372_s16 = sadd.s32 4294967294, %s600_s14   ;;  %s600_s14 = sphi %s630_s14, %s21_s14   ;;  %s596_s13 = sphi %s628_s13, %s804_s13   ;;  %s592_s12 = sphi %s626_s12, %s803_s12   ;;  %s588_s11 = sphi %s624_s11, %s802_s11   ;;  %s584_s10 = sphi %s622_s10, %s801_s10   ;;  %s580_s9 = sphi %s620_s9, %s800_s9  }
   0x9   : > { %s33_s17 = sadd.s32 1, %s596_s13  ;;  %s42_s18 = sadd.s32 1, %s588_s11 }
   0xa   : > { %p35_p0 = scmp.ge.s32.totalorder %s33_s17, 2  ;;  %p49_p1 = scmp.ne.s32.totalorder %s588_s11, %s584_s10 }
   0xb   : > { %p50_p2 = scmp.eq.s32.totalorder %s600_s14, 0  ;;  %p55_p3 = scmp.ne.s32.totalorder %s584_s10, %s580_s9 }
   0xc   : > { %s806_s17 = smov (%p35_p0, %s33_s17), 0  ;;  %p56_p5 = scmp.eq.s32.totalorder %s371_s15, 0 }
   0xd   : > { %p661_p4 = por %p50_p2, %p49_p1  ;;  %s38_s20 = ssub.s32 %s596_s13, %s806_s17 }
   0xe   : > { %p107_p6 = scmp.eq.s32.totalorder %s371_s15, 1  ;;  %p40_p7 = scmp.eq.s32.totalorder %s38_s20, 0 }
   0xf   : > { %p667_p8 = por %p56_p5, %p55_p3  ;;  %p113_p10 = scmp.eq.s32.totalorder %s372_s16, 1 }
  0x10   : > { %p671_p9 = por %p107_p6, %p49_p1  ;;  %p410_p13 = scmp.lt.s32.totalorder %s600_s14, 2 }
  0x11   : > { %s676_s23 = scalar_select %p40_p7, %s588_s11, %s42_s18  }
  0x12   : > { %p678_p11 = por %p113_p10, %p55_p3  ;;  %s685_s25 = sand.u32 1, %s588_s11  }
  0x13   : > { %s375_s26 = sshll.u32 %s685_s25, 4  ;;  %s390_s27 = sshll.u32 %s596_s13, 8 }
  0x14   : > { %s145_s30 = scalar_lea.hbm %s790_s0, %s390_s27  ;;  %s137_s3 = scalar_lea.vmem [#allocation2], %s375_s26 }
  0x15   : > { %s147_s4 = sshll.u32 %s137_s3, 4  ;;  %p694_p0 = pnand %p410_p13, %p661_p4  ;;  %s148_s4 = int_to_ptr.vmem [resolvable:$true] %s147_s4 }
  0x16   : > { %p381_p1 = scmp.ge.s32.totalorder %s600_s14, 1  ;;  %p171_p2 = scmp.lt.s32.totalorder %s600_s14, 3 }
  0x17   : > { %s134_s6 = scalar_lea.sflag [#allocation3], %s685_s25  ;;  %p462_p3 = pneg %p694_p0 }
  0x18   : > { %s473_s7 = scalar_lea.vmem %s148_s4, 256  ;;  %s602_s8 = smov [#allocation2]  }
  0x19   : > { %p474_p5 = scmp.ne.s32.totalorder %s148_s4, %s473_s7  ;;  %s478_s15 = sshll.u32 %s602_s8, 4  ;;  %s479_s15 = int_to_ptr.vmem [resolvable:$false] %s478_s15 }
  0x1a   : > { %s480_s16 = scalar_lea.vmem %s479_s15, 512  ;;  %p481_p4 = scmp.lt.s32.totalorder %s148_s4, %s479_s15 }
  0x1b   : > { %p476_p6 = pnand %p474_p5, %p462_p3  ;;  %p482_p10 = scmp.lt.s32.totalorder %s480_s16, %s473_s7 }
  0x1d   : > { %p477_p7 = pneg %p476_p6  ;;  %p483_p13 = por %p482_p10, %p481_p4 }
  0x1f   : > { %p484_p12 = pnand %p483_p13, %p477_p7 }
  0x21   : > { %487 = shalt.err (!%p484_p12)
}
  0x22   : > { %402 = dma.hbm_to_vmem [thread:$0]  (!%p694_p0), %s145_s30, 256, %s148_s4, %s134_s6  }
  0x23   : > { %p712_p5 = pnand %p381_p1, %p171_p2  ;;  %s378_s19 = sshll.u32 %s685_s25, 2 }
  0x24   : > { %s391_s20 = sshll.u32 %s596_s13, 6  ;;  %s158_s29 = scalar_lea.vmem [#allocation5], %s378_s19 }
  0x25   : > { %s164_s28 = scalar_lea.hbm %s791_s1, %s391_s20  ;;  %s166_s3 = sshll.u32 %s158_s29, 4  ;;  %s167_s3 = int_to_ptr.vmem [resolvable:$true] %s166_s3 }
  0x26   : > { %s155_s7 = scalar_lea.sflag [#allocation6], %s685_s25  ;;  %s501_s8 = scalar_lea.vmem %s167_s3, 64 }
  0x27   : > { %p502_p12 = scmp.ne.s32.totalorder %s167_s3, %s501_s8  ;;  %s603_s30 = smov [#allocation5]  }
  0x28   : > { %s506_s4 = sshll.u32 %s603_s30, 4  ;;  %s507_s4 = int_to_ptr.vmem [resolvable:$false] %s506_s4 }
  0x29   : > { %p504_p6 = pnand %p502_p12, %p462_p3  ;;  %s508_s6 = scalar_lea.vmem %s507_s4, 128 }
  0x2a   : > { %p509_p1 = scmp.lt.s32.totalorder %s167_s3, %s507_s4  ;;  %p510_p2 = scmp.lt.s32.totalorder %s508_s6, %s501_s8 }
  0x2b   : > { %p505_p7 = pneg %p504_p6 }
  0x2c   : > { %p511_p4 = por %p510_p2, %p509_p1 }
  0x2e   : > { %p512_p10 = pnand %p511_p4, %p505_p7 }
  0x30   : > { %515 = shalt.err (!%p512_p10)
}
  0x31   : > { %405 = dma.hbm_to_vmem [thread:$0]  (!%p694_p0), %s164_s28, 64, %s167_s3, %s155_s7  }
  0x32   : > { %175 = sbr.rel (%p712_p5) target bundleno = 84 (0x54), region = 28  ;;  %s730_s25 = sand.u32 (!%p712_p5), 1, %s584_s10  }
  0x33   : > { %s382_s15 = sshll.u32 (!%p712_p5), %s730_s25, 4  ;;  %s178_s16 = scalar_lea.sflag (!%p712_p5), [#allocation3], %s730_s25 }
  0x34   : > { %s181_s19 = scalar_lea.vmem (!%p712_p5), [#allocation2], %s382_s15 }
  0x37   : > { %567 = dma.done.wait (%p667_p8), %s178_s16, 256  }
  0x38   : > { %569 = vsyncadd (%p667_p8), %s178_s16, 4294967040  ;;  %s383_s5 = sshll.u32 %s730_s25, 2  ;;  %s187_s18 = scalar_lea.sflag [#allocation6], %s730_s25 }
  0x39   : > { %s190_s20 = scalar_lea.vmem [#allocation5], %s383_s5 }
  0x3a   : > { %571 = dma.done.wait (%p667_p8), %s187_s18, 64  }
  0x3b   : > { %573 = vsyncadd (%p667_p8), %s187_s18, 4294967232  ;;  %v223_v0 = vlaneseq  ;;  %v221_v6 = vld [vmem:[%s190_s20] sm:$0xf]  ;;  %s215_s26 = scalar_lea.vmem [#allocation7], %s382_s15  ;;  %v220_v12 = vld [vmem:[%s181_s19 + $0x8] sm:$0xff]  ;;  %s392_s21 = sshll.u32 %s592_s12, 8 }
  0x3c   : > { %v219_v11 = vld [vmem:[%s181_s19] sm:$0xff]  ;;  %s264_s27 = sshll.u32 %s215_s26, 4  ;;  %s262_s3 = scalar_lea.hbm %s792_s2, %s392_s21  ;;  %s745_s27 = int_to_ptr.vmem [resolvable:$true] %s264_s27 }
  0x3d   : > { %v224_v1 = vshrl.u32 %v223_v0, 7  ;;  %s248_s7 = scalar_lea.sflag [#allocation4], %s730_s25  ;;  %s516_s8 = scalar_lea.vmem %s745_s27, 256 }
  0x3e   : > { %p517_p8 = scmp.ne.s32.totalorder %s745_s27, %s516_s8  ;;  %s604_s12 = smov [#allocation7]  }
  0x3f   : > { %v225_v2 = vsub.s32 0, %v224_v1  ;;  %v229_v3 = vsub.s32 1, %v224_v1  ;;  %v233_v4 = vsub.s32 2, %v224_v1  ;;  %v237_v5 = vsub.s32 3, %v224_v1  ;;  %s520_s30 = sshll.u32 %s604_s12, 4  ;;  %s521_s30 = int_to_ptr.vmem [resolvable:$false] %s520_s30 }
  0x40   : > { %p518_p0 = pnand %p517_p8, %p671_p9  ;;  %s522_s4 = scalar_lea.vmem %s521_s30, 512 }
  0x41   : > { %v226_v7 = vrot.slane %v221_v6, %v225_v2  ;;  %v230_v8 = vrot.slane %v221_v6, %v229_v3  ;;  %v234_v9 = vrot.slane %v221_v6, %v233_v4  ;;  %v238_v10 = vrot.slane %v221_v6, %v237_v5  ;;  %p523_p13 = scmp.lt.s32.totalorder %s745_s27, %s521_s30  ;;  %p524_p5 = scmp.lt.s32.totalorder %s522_s4, %s516_s8 }
  0x42   : > { %p519_p3 = pneg %p518_p0 }
  0x43   : > { %v239_v13 = vcombine.low %v226_v7, %v230_v8  ;;  %v240_v14 = vcombine.low %v234_v9, %v238_v10  ;;  %p525_p12 = por %p524_p5, %p523_p13 }
  0x45   : > { %v243_v15 = vadd.f32 %v239_v13, %v219_v11  ;;  %v244_v16 = vadd.f32 %v240_v14, %v220_v12  ;;  %p526_p6 = pnand %p525_p12, %p519_p3 }
  0x47   : > { %245 = vst [vmem:[%s215_s26] sm:$0xff] %v243_v15  ;;  %246 = vst [vmem:[%s215_s26 + $0x8] sm:$0xff] %v244_v16 }
  0x48   : > { %529 = shalt.err (!%p526_p6)
}
  0x49   : > { %s530_s6 = scalar_lea.hbm %s262_s3, 256  ;;  %s534_s16 = scalar_lea.hbm %s792_s2, 512 }
  0x4a   : > { %p531_p7 = scmp.ne.s32.totalorder %s262_s3, %s530_s6  ;;  %p535_p4 = scmp.lt.s32.totalorder %s262_s3, %s792_s2 }
  0x4b   : > { %p536_p10 = scmp.lt.s32.totalorder %s534_s16, %s530_s6 }
  0x4c   : > { %p532_p1 = pnand %p531_p7, %p671_p9 }
  0x4d   : > { %p537_p8 = por %p536_p10, %p535_p4 }
  0x4e   : > { %p533_p2 = pneg %p532_p1 }
  0x50   : > { %p538_p0 = pnand %p537_p8, %p533_p2 }
  0x52   : > { %541 = shalt.err (!%p538_p0)
}
  0x53   : > { %397 = dma.vmem_to_hbm [thread:$0]  (%p671_p9), %s745_s27, 256, %s262_s3, %s248_s7  }
  0x54 PF: > { %s276_s18 = sand.u32 1, %s580_s9   ;;  %p799_p3 = scmp.ge.s32.totalorder %s600_s14, 2 }
  0x55   : > { %s277_s20 = scalar_lea.sflag [#allocation4], %s276_s18 }
  0x56   : > { %p407_p13 = pnand %p799_p3, %p678_p11 }
  0x58   : > { %p408_p5 = pneg %p407_p13 }
  0x5a   : > { %575 = dma.done.wait (%p408_p5), %s277_s20, 256  }
  0x5b   : > { %577 = vsyncadd (%p408_p5), %s277_s20, 4294967040  ;;  %s21_s14 = sadd.s32 1, %s600_s14   ;;  %s800_s9 = smov %s584_s10 }
  0x5c   : > { %p18_p12 = scmp.ge.s32.totalorder %s21_s14, 4   ;;  %s801_s10 = smov %s588_s11 }
  0x5d   : > { %s802_s11 = smov %s676_s23  ;;  %s803_s12 = smov %s596_s13 }
  0x5e   : > { %s804_s13 = smov %s806_s17  ;;  %20 = sbr.rel (!%p18_p12) target bundleno = 8 (0x8), region = 86 }
  0x63   :  { %282 = vsyncpa [#allocation3], 1 }
  0x64   :  { %284 = vsyncpa [#allocation3 + $0x1], 1 }
  0x65   :  { %285 = vsyncpa [#allocation6], 1 }
  0x66   :  { %287 = vsyncpa [#allocation6 + $0x1], 1 }
  0x67   :  { %288 = vsyncpa [#allocation4], 1 }
  0x68   :  { %290 = vsyncpa [#allocation4 + $0x1], 1 }

</bundles_post_ra>
